<compile_context>
chip_gen: v7x
topology: tpu7x:2x2x1
jax: 0.10.0
libtpu: 0.0.40
codegen_flags: <defaults>
</compile_context>

<pallas_src>
import functools

import jax
import jax.numpy as jnp
from jax.experimental import pallas as pl
from jax.experimental.pallas import tpu as pltpu

LANES = 128
SUBLANES = 8


def task_encode_kernel(x_ref, p_ref, out_ref, *, H, L):
    # x_ref   : (B, 1)      raw task_des[0] values (one per batch row)
    # p_ref   : (H+3, Lp)   packed params:
    #             rows 0..H-1 : w2 (H, L) zero-padded to Lp lanes
    #             row  H      : w1 (H,)  in lanes 0..H-1
    #             row  H+1    : b1 (H,)  in lanes 0..H-1
    #             row  H+2    : b2 (L,)  in lanes 0..L-1 (padding = 0)
    # out_ref : (B, Lp)     log_softmax(e/4) in lanes 0..L-1 (rest = garbage)
    B, Lp = out_ref.shape

    x = x_ref[...] / 10.0                                   # (B, 1)

    w1 = p_ref[H:H + 1, 0:H]                                # (1, H)
    b1 = p_ref[H + 1:H + 2, 0:H]                            # (1, H)
    b2 = p_ref[H + 2:H + 3, :]                              # (1, Lp), pad lanes 0
    w2 = p_ref[0:H, :]                                      # (H, Lp), pad lanes 0

    # encoder layer 1: Linear(1 -> H) + ReLU  == outer product row-scale
    h = jnp.maximum(x * w1 + b1, 0.0)                       # (B, H)

    # encoder layer 2: Linear(H -> L) on the MXU (batched -> M = B rows)
    e = jnp.dot(h, w2, preferred_element_type=jnp.float32) + b2   # (B, Lp)

    # log_softmax(e / 4) over the (masked) feature lanes
    z = e * 0.25
    lane = jax.lax.broadcasted_iota(jnp.int32, (B, Lp), 1)
    valid = lane < L
    m = jnp.max(jnp.where(valid, z, -1e30), axis=-1, keepdims=True)
    s = jnp.sum(jnp.where(valid, jnp.exp(z - m), 0.0), axis=-1, keepdims=True)
    out_ref[...] = z - (m + jnp.log(s))


def pack_params(w1, b1, w2, b2, lanes=LANES):
    """Pack all TaskEncode encoder params into one (H+3, lanes) f32 buffer."""
    H = w1.shape[1]
    L = w2.shape[1]
    assert H <= lanes and L <= lanes
    p = jnp.zeros((H + 3, lanes), jnp.float32)
    p = p.at[:H, :L].set(w2.astype(jnp.float32))
    p = p.at[H, :H].set(w1.reshape(-1).astype(jnp.float32))
    p = p.at[H + 1, :H].set(b1.reshape(-1).astype(jnp.float32))
    p = p.at[H + 2, :L].set(b2.reshape(-1).astype(jnp.float32))
    return p


@functools.partial(jax.jit, static_argnums=(2, 3))
def task_encode_forward(task_scalars, packed_params, H, L):
    """task_scalars: scalar (task_des[0]) or (B,) vector of task scalars.

    Returns (L,) for a scalar input (matching the PyTorch module) or (B, L)
    for a batched input.
    """
    ts = jnp.asarray(task_scalars, jnp.float32)
    single = ts.ndim == 0
    ts = jnp.atleast_1d(ts)
    B = ts.shape[0]
    Bp = ((B + SUBLANES - 1) // SUBLANES) * SUBLANES
    Lp = packed_params.shape[1]

    x = jnp.zeros((Bp, 1), jnp.float32).at[:B, 0].set(ts)

    out = pl.pallas_call(
        functools.partial(task_encode_kernel, H=H, L=L),
        out_shape=jax.ShapeDtypeStruct((Bp, Lp), jnp.float32),
        in_specs=[
            pl.BlockSpec(memory_space=pltpu.MemorySpace.VMEM),
            pl.BlockSpec(memory_space=pltpu.MemorySpace.VMEM),
        ],
        out_specs=pl.BlockSpec(memory_space=pltpu.MemorySpace.VMEM),
    )(x, packed_params)

    out = out[:B, :L]
    return out[0] if single else out


def reference_forward(task_scalars, w1, b1, w2, b2):
    x = jnp.asarray(task_scalars, jnp.float32).reshape(-1, 1) / 10.0
    h = jnp.maximum(x * w1 + b1, 0.0)
    e = h @ w2 + b2
    z = e * 0.25
    out = z - jax.scipy.special.logsumexp(z, axis=-1, keepdims=True)
    return out


if __name__ == "__main__":
    latent_dim = 32          # "hidden=32"
    H = latent_dim // 2      # 16
    L = latent_dim           # 32

    # Deterministic init mirroring reset_para(): N(0, 0.01) weights, zero bias.
    # PyTorch Linear stores (out, in); we store transposed (in, out) for h @ W.
    key = jax.random.PRNGKey(0)
    k1, k2 = jax.random.split(key)
    w1 = (0.01 * jax.random.normal(k1, (H, 1), jnp.float32)).T        # (1, H)
    b1 = jnp.zeros((1, H), jnp.float32)
    w2 = (0.01 * jax.random.normal(k2, (L, H), jnp.float32)).T        # (H, L)
    b2 = jnp.zeros((1, L), jnp.float32)

    packed = pack_params(w1, b1, w2, b2)

    # 1) Single-task call, exactly the PyTorch forward semantics.
    task_des = jnp.array([3.0, 1.0, 2.0], jnp.float32)
    latent_pred = task_encode_forward(task_des[0], packed, H, L)
    jax.block_until_ready(latent_pred)
    assert latent_pred.shape == (latent_dim,)
    ref_single = reference_forward(task_des[0], w1, b1, w2, b2).reshape(-1)
    assert jnp.allclose(latent_pred, ref_single, atol=1e-5, rtol=1e-5), \
        "single-task mismatch vs reference"

    # 2) Batched call: 8 task scalars in one pallas_call (amortized launch/DMA).
    batch_scalars = jnp.array([3.0, 7.5, -2.0, 11.0, 0.0, 4.2, 9.9, 1.0],
                              jnp.float32)
    latent_batch = task_encode_forward(batch_scalars, packed, H, L)
    jax.block_until_ready(latent_batch)
    assert latent_batch.shape == (batch_scalars.shape[0], latent_dim)
    ref_batch = reference_forward(batch_scalars, w1, b1, w2, b2)
    assert jnp.allclose(latent_batch, ref_batch, atol=1e-5, rtol=1e-5), \
        "batched mismatch vs reference"

    print("KERNEL_OK")
</pallas_src>

<mosaic_0001>
module attributes {stable_mosaic.version = 11 : i64} {
  func.func @task_encode_kernel(%arg0: memref<8x1xf32, #tpu.memory_space<vmem>>, %arg1: memref<19x128xf32, #tpu.memory_space<vmem>>, %arg2: memref<8x128xf32, #tpu.memory_space<vmem>>) attributes {dimension_semantics = [], scalar_prefetch = 0 : i64, scratch_operands = 0 : i64, tpu.core_type = #tpu.core_type<tc>} {
    %c0 = arith.constant 0 : index
    %c0_0 = arith.constant 0 : index
    %0 = vector.load %arg0[%c0, %c0_0] : memref<8x1xf32, #tpu.memory_space<vmem>>, vector<8x1xf32>
    %cst = arith.constant 1.000000e+01 : f32
    %1 = vector.broadcast %cst : f32 to vector<8x1xf32>
    %2 = arith.divf %0, %1 : vector<8x1xf32>
    %c16 = arith.constant 16 : index
    %c0_1 = arith.constant 0 : index
    %3 = vector.load %arg1[%c16, %c0_1] : memref<19x128xf32, #tpu.memory_space<vmem>>, vector<1x16xf32>
    %c17 = arith.constant 17 : index
    %c0_2 = arith.constant 0 : index
    %4 = vector.load %arg1[%c17, %c0_2] : memref<19x128xf32, #tpu.memory_space<vmem>>, vector<1x16xf32>
    %c18 = arith.constant 18 : index
    %c0_3 = arith.constant 0 : index
    %5 = vector.load %arg1[%c18, %c0_3] : memref<19x128xf32, #tpu.memory_space<vmem>>, vector<1x128xf32>
    %c0_4 = arith.constant 0 : index
    %c0_5 = arith.constant 0 : index
    %6 = vector.load %arg1[%c0_4, %c0_5] : memref<19x128xf32, #tpu.memory_space<vmem>>, vector<16x128xf32>
    %7 = vector.broadcast %2 : vector<8x1xf32> to vector<8x16xf32>
    %8 = vector.broadcast %3 : vector<1x16xf32> to vector<8x16xf32>
    %9 = arith.mulf %7, %8 : vector<8x16xf32>
    %10 = vector.broadcast %4 : vector<1x16xf32> to vector<8x16xf32>
    %11 = arith.addf %9, %10 : vector<8x16xf32>
    %cst_6 = arith.constant 0.000000e+00 : f32
    %12 = vector.broadcast %cst_6 : f32 to vector<8x16xf32>
    %13 = arith.maximumf %11, %12 : vector<8x16xf32>
    %cst_7 = arith.constant dense<0.000000e+00> : vector<8x128xf32>
    %14 = tpu.matmul %13, %6, %cst_7 {dimension_numbers = #tpu.dot_dimension_numbers<[1], [0], [0], [1], [0, 0, 1, 1], [], []>} : vector<8x16xf32>, vector<16x128xf32>, vector<8x128xf32> -> vector<8x128xf32>
    %15 = vector.broadcast %5 : vector<1x128xf32> to vector<8x128xf32>
    %16 = arith.addf %14, %15 : vector<8x128xf32>
    %cst_8 = arith.constant 2.500000e-01 : f32
    %17 = vector.broadcast %cst_8 : f32 to vector<8x128xf32>
    %18 = arith.mulf %16, %17 : vector<8x128xf32>
    %19 = tpu.iota {dimensions = array<i32: 1>} : vector<8x128xi32>
    %c32_i32 = arith.constant 32 : i32
    %20 = vector.broadcast %c32_i32 : i32 to vector<8x128xi32>
    %21 = arith.cmpi slt, %19, %20 : vector<8x128xi32>
    %cst_9 = arith.constant -1.000000e+30 : f32
    %22 = vector.broadcast %cst_9 : f32 to vector<8x128xf32>
    %23 = arith.select %21, %18, %22 : vector<8x128xi1>, vector<8x128xf32>
    %cst_10 = arith.constant dense<0xFF800000> : vector<8xf32>
    %24 = vector.multi_reduction <maximumf>, %23, %cst_10 [1] : vector<8x128xf32> to vector<8xf32>
    %25 = vector.shape_cast %24 : vector<8xf32> to vector<8x1xf32>
    %26 = vector.broadcast %25 : vector<8x1xf32> to vector<8x128xf32>
    %27 = arith.subf %18, %26 : vector<8x128xf32>
    %28 = math.exp %27 : vector<8x128xf32>
    %cst_11 = arith.constant 0.000000e+00 : f32
    %29 = vector.broadcast %cst_11 : f32 to vector<8x128xf32>
    %30 = arith.select %21, %28, %29 : vector<8x128xi1>, vector<8x128xf32>
    %cst_12 = arith.constant dense<0.000000e+00> : vector<8xf32>
    %31 = vector.multi_reduction <add>, %30, %cst_12 [1] : vector<8x128xf32> to vector<8xf32>
    %32 = vector.shape_cast %31 : vector<8xf32> to vector<8x1xf32>
    %33 = math.log %32 : vector<8x1xf32>
    %34 = arith.addf %25, %33 : vector<8x1xf32>
    %35 = vector.broadcast %34 : vector<8x1xf32> to vector<8x128xf32>
    %36 = arith.subf %18, %35 : vector<8x128xf32>
    %c0_13 = arith.constant 0 : index
    %c0_14 = arith.constant 0 : index
    %37 = vector.load %arg2[%c0_13, %c0_14] : memref<8x128xf32, #tpu.memory_space<vmem>>, vector<8x128xf32>
    tpu.vector_store %arg2[%c0_13, %c0_14], %36 {strides = array<i32>} : memref<8x128xf32, #tpu.memory_space<vmem>>, vector<8x128xf32>,
    return
  }
}

</mosaic_0001>

<bundles_post_ra>
// kernel: task_encode_forward.1
= control target key start
LH: loop header
LB: loop body
LE: loop exit
PB: predicated region body
PF: predicated region fallthrough
CT: control target
= control target key end

     0   :  { %7 = vsyncpa [#allocation3], 0  ;;  %s203_s9 = smov [#allocation2]   ;;  %s243_s0 = inlined_call_operand.vmem [shape: f32[8,1], index: 0, kind: input, shape index: {}]   ;;  %s244_s1 = inlined_call_operand.hbm [shape: f32[19,128], index: 1, kind: input, shape index: {}]   ;;  %s245_s2 = inlined_call_operand.vmem [shape: f32[8,128], index: 2, kind: output, shape index: {}]  }
   0x1   :  { %s15_s10 = sshll.u32 %s203_s9, 4  ;;  %s179_s13 = scalar_lea.hbm %s244_s1, 384  ;;  %s16_s10 = int_to_ptr.vmem [resolvable:$true] %s15_s10 }
   0x2   :  { %p180_p0 = scmp.ne.s32.totalorder %s244_s1, %s179_s13  ;;  %p183_p1 = scmp.lt.u32.totalorder %s179_s13, %s244_s1 }
   0x4   :  { %p185_p2 = pnand %p183_p1, %p180_p0 }
   0x6   :  { %188 = shalt.err (!%p185_p2)
}
   0x7   :  { %s189_s18 = scalar_lea.vmem %s16_s10, 384  ;;  %p194_p4 = scmp.lt.s32.totalorder %s16_s10, %s16_s10 }
   0x8   :  { %p190_p3 = scmp.ne.s32.totalorder %s16_s10, %s189_s18  ;;  %p195_p5 = scmp.lt.s32.totalorder %s189_s18, %s189_s18 }
   0xa   :  { %p196_p6 = por %p195_p5, %p194_p4 }
   0xc   :  { %p197_p7 = pnand %p196_p6, %p190_p3 }
   0xe   :  { %200 = shalt.err (!%p197_p7)
}
   0xf   :  { %s204_s19 = smov 128   ;;  %s205_s20 = smov 8  }
  0x10   :  { %21 = dma.hbm_to_vmem [thread:$0]  %s244_s1, 384, %s16_s10, [#allocation3], %s204_s19, %s204_s19, %s205_s20  }
  0x11   :  { %201 = dma.done.wait [#allocation3], 384  }
  0x12   :  { %202 = vsyncadd [#allocation3], 4294966912  ;;  %v206_v0 = vmov 0   ;;  %v25_v1 = vld [vmem:[%s243_s0] sm:$0xff]  ;;  %v32_v4 = vld [vmem:[#allocation2 + $0x8] sm:$0xff]  ;;  %v207_v6 = vmov 0.0|0.0   ;;  %v128_v14 = vlaneseq }
  0x13   :  { %174 = vset.pattern.permute.xlu0 %v206_v0  ;;  %v27_v2 = vmul.f32 0.1, %v25_v1  ;;  %v31_v3 = vld [vmem:[#allocation2] sm:$0xff]  ;;  %164 = vmatprep.subr.bf16.mxu0 %v207_v6  ;;  %vm208_vm0 = vmmov 0   ;;  %v209_v7 = vmov 0.0   ;;  %vm53_vm1 = vcmask 130048  }
  0x14   :  { %v165_v5 = vpack.c.bf16 %v32_v4, %v31_v3  ;;  %161 = vmatprep.mubr.msk.f32.mxu0 %vm208_vm0, %v209_v7  ;;  %v150_v8 = vld [vmem:[#allocation2 + $0x10] ss:$0 sm:$0xff]  ;;  %v151_v9 = vld [vmem:[#allocation2 + $0x11] ss:$0 sm:$0xff]  ;;  %v152_v15 = vld [vmem:[#allocation2 + $0x12] ss:$0 sm:$0xff] }
  0x15   :  { %35 = vperm.xlu0 %174, %v27_v2   ;;  %v129_v16 = vand.u32 127, %v128_v14 }
  0x16   :  { %166 = vmatpush3.bf16.msra.mxu0 %v165_v5 }
  0x17   :  { %vm130_vm2 = vcmp.lt.s32.totalorder %v129_v16, 32 }
  0x94   :  { %v36_v10 = vpop.permute.xlu0 %35 }
  0x95   :  { %v42_v11 = vmul.f32 %v150_v8, %v36_v10 }
  0x97   :  { %v47_v12 = vadd.f32 %v151_v9, %v42_v11 }
  0x99   :  { %v48_v13 = vmax.f32 %v47_v12, 0.0 }
  0x9b   :  { %162 = vmatmul.mubr.msk.f32.vlgmr.msra.gmra.mrb[0].mxu0 %vm53_vm1, %v48_v13 }
 0x16e   :  { %v123_v17 = vpop.f32.mrb[0].mxu0 }
 0x16f   :  { %v124_v18 = vadd.f32 %v152_v15, %v123_v17  ;;  %v163_v19 = vpop.f32.mrb[1].mxu0 }
 0x171   :  { %v127_v20 = vmul.f32 0.25, %v124_v18 }
 0x173   :  { %v131_v21 = vsel %vm130_vm2, %v127_v20, -1e+30 }
 0x174   :  { %132 = vmax.xlane.f32.xlu0 %v131_v21 }
 0x201   :  { %v133_v22 = vpop.xlane.xlu0 %132 }
 0x202   :  { %v134_v23 = vsub.f32 %v127_v20, %v133_v22 }
 0x204   :  { %v135_v24 = vmul.f32 1.442695, %v134_v23 }
 0x206   :  { %175 = vpow2.f32 %v135_v24 }
 0x210   :  { %v176_v25 = vpop.eup %175 }
 0x211   :  { %v137_v26 = vsel %vm130_vm2, %v176_v25, 0.0 }
 0x212   :  { %138 = vadd.xlane.f32.xlu1 %v137_v26 }
 0x29f   :  { %v139_v27 = vpop.xlane.xlu1 %138 }
 0x2a0   :  { %177 = vlog2.f32 %v139_v27 }
 0x2aa   :  { %v178_v28 = vpop.eup %177 }
 0x2ab   :  { %v141_v29 = vmul.f32 0.6931472, %v178_v28 }
 0x2ad   :  { %v142_v30 = vadd.f32 %v141_v29, %v133_v22 }
 0x2af   :  { %v143_v31 = vsub.f32 %v127_v20, %v142_v30 }
 0x2b1   :  { %144 = vst [vmem:[%s245_s2] sm:$0xff] %v143_v31 }
 0x2b2   :  { %149 = vsyncpa [#allocation3], 1 }

</bundles_post_ra>
